<compile_context>
chip_gen: v7x
topology: tpu7x:2x2x1
jax: 0.10.0
libtpu: 0.0.40
codegen_flags: <defaults>
</compile_context>

<pallas_src>
import functools

import jax
import jax.numpy as jnp
from jax.experimental import pallas as pl
from jax.experimental.pallas import tpu as pltpu

H1 = 128   # hidden width of layer 1
H2 = 64    # output width of layer 2


def _round_up(x, m):
    return (x + m - 1) // m * m


# --------------------------------------------------------------------------- #
# Kernel
# --------------------------------------------------------------------------- #
def subnet_kernel(x_ref, w1_ref, t1_ref, w2_ref, t2_ref, o_ref):
    # Layer 1: Linear + folded BatchNorm (running stats) + ReLU  (Dropout = identity, eval)
    h = jnp.dot(x_ref[...], w1_ref[...], preferred_element_type=jnp.float32)
    h = jnp.maximum(h + t1_ref[...], 0.0)
    # Layer 2: Linear + folded BatchNorm + ReLU
    o = jnp.dot(h, w2_ref[...], preferred_element_type=jnp.float32)
    o_ref[...] = jnp.maximum(o + t2_ref[...], 0.0).astype(o_ref.dtype)


# --------------------------------------------------------------------------- #
# Parameter prep (fold linear bias + BN into weights / a single shift)
# --------------------------------------------------------------------------- #
def fold_params(raw, eps=1e-5):
    (w1, b1, g1, be1, rm1, rv1, w2, b2, g2, be2, rm2, rv2) = raw
    s1 = g1 / jnp.sqrt(rv1 + eps)
    w1f = (w1 * s1).astype(jnp.float32)                  # [D, 128]
    t1f = ((b1 - rm1) * s1 + be1).astype(jnp.float32)    # [1, 128]

    s2 = g2 / jnp.sqrt(rv2 + eps)
    w2f = (w2 * s2).astype(jnp.float32)                  # [128, 64]
    t2f = ((b2 - rm2) * s2 + be2).astype(jnp.float32)    # [1, 64]
    return w1f, t1f, w2f, t2f


# --------------------------------------------------------------------------- #
# Wrapper
# --------------------------------------------------------------------------- #
def _tile_and_vmem():
    """Generation-specific batch tile and VMEM budget (weights are tiny & resident)."""
    try:
        kind = jax.devices()[0].device_kind.lower()
    except Exception:  # pragma: no cover
        kind = ""
    if "v7" in kind:
        return 2048, 32 << 20      # v7x: 64 MiB VMEM / TC -> keep headroom
    if "v5" in kind:
        return 2048, 64 << 20
    return 4096, 64 << 20          # v6e / default


@functools.partial(jax.jit, static_argnames=("tile_n", "vmem_limit_bytes", "out_dtype"))
def _subnet_call(x, w1, t1, w2, t2, *, tile_n, vmem_limit_bytes, out_dtype):
    n, d = x.shape
    grid = (pl.cdiv(n, tile_n),)
    out_itemsize = jnp.dtype(out_dtype).itemsize
    flops = 2 * n * (d * H1 + H1 * H2)
    bytes_accessed = (x.size * x.dtype.itemsize
                      + (w1.size + t1.size + w2.size + t2.size) * 4
                      + n * H2 * out_itemsize)
    return pl.pallas_call(
        subnet_kernel,
        out_shape=jax.ShapeDtypeStruct((n, H2), out_dtype),
        grid=grid,
        in_specs=[
            pl.BlockSpec((tile_n, d), lambda i: (i, 0)),   # x: streamed per batch tile
            pl.BlockSpec((d, H1), lambda i: (0, 0)),       # W1': VMEM-resident
            pl.BlockSpec((1, H1), lambda i: (0, 0)),       # t1': resident
            pl.BlockSpec((H1, H2), lambda i: (0, 0)),      # W2': resident
            pl.BlockSpec((1, H2), lambda i: (0, 0)),       # t2': resident
        ],
        out_specs=pl.BlockSpec((tile_n, H2), lambda i: (i, 0)),
        compiler_params=pltpu.CompilerParams(
            dimension_semantics=("parallel",),
            vmem_limit_bytes=vmem_limit_bytes),
        cost_estimate=pl.CostEstimate(
            flops=flops, transcendentals=0, bytes_accessed=bytes_accessed),
    )(x, w1, t1, w2, t2)


def subnet_forward(x, folded_params, out_dtype=jnp.bfloat16):
    w1, t1, w2, t2 = folded_params
    n = x.shape[0]
    tile_base, vmem_limit = _tile_and_vmem()
    # Sublane-aligned tile; prefer >= 2 grid steps (v7x shards the parallel axis over
    # its 2 TensorCores), capped by the generation-specific base tile.
    tile_n = max(8, min(tile_base, _round_up(-(-n // 2), 8)))
    return _subnet_call(x, w1, t1, w2, t2,
                        tile_n=tile_n, vmem_limit_bytes=vmem_limit,
                        out_dtype=out_dtype)


# --------------------------------------------------------------------------- #
# Synthetic parameters (PyTorch-like) + pure-JAX reference
# --------------------------------------------------------------------------- #
def init_params(key, input_dim):
    ks = jax.random.split(key, 10)

    # Linear 1: torch weight [128, input_dim] -> stored transposed [input_dim, 128]
    lim1 = 1.0 / jnp.sqrt(float(input_dim))
    w1 = jax.random.uniform(ks[0], (input_dim, H1), jnp.float32, -lim1, lim1)
    b1 = jax.random.uniform(ks[1], (1, H1), jnp.float32, -lim1, lim1)
    g1 = 1.0 + 0.1 * jax.random.normal(ks[2], (1, H1), jnp.float32)
    be1 = 0.1 * jax.random.normal(ks[3], (1, H1), jnp.float32)
    rm1 = 0.05 * jax.random.normal(ks[4], (1, H1), jnp.float32)
    rv1 = 1.0 + 0.1 * jax.random.uniform(ks[5], (1, H1), jnp.float32)

    # Linear 2: torch weight [64, 128] -> stored transposed [128, 64]
    lim2 = 1.0 / jnp.sqrt(float(H1))
    w2 = jax.random.uniform(ks[6], (H1, H2), jnp.float32, -lim2, lim2)
    b2 = jax.random.uniform(ks[7], (1, H2), jnp.float32, -lim2, lim2)
    g2 = 1.0 + 0.1 * jax.random.normal(ks[8], (1, H2), jnp.float32)
    be2 = 0.1 * jax.random.normal(ks[9], (1, H2), jnp.float32)
    rm2 = jnp.zeros((1, H2), jnp.float32)
    rv2 = jnp.ones((1, H2), jnp.float32)

    return (w1, b1, g1, be1, rm1, rv1, w2, b2, g2, be2, rm2, rv2)


def subnet_ref(x, raw, eps=1e-5):
    """Eval-mode PyTorch-equivalent forward in pure f32 JAX."""
    (w1, b1, g1, be1, rm1, rv1, w2, b2, g2, be2, rm2, rv2) = raw
    h = x @ w1 + b1
    h = (h - rm1) / jnp.sqrt(rv1 + eps) * g1 + be1
    h = jnp.maximum(h, 0.0)
    o = h @ w2 + b2
    o = (o - rm2) / jnp.sqrt(rv2 + eps) * g2 + be2
    return jnp.maximum(o, 0.0)


if __name__ == "__main__":
    key = jax.random.PRNGKey(0)
    k_x, k_p, k_x2 = jax.random.split(key, 3)

    input_dim = 32
    raw_params = init_params(k_p, input_dim)
    folded_params = fold_params(raw_params)

    # Small batch (matches the original harness shape).
    x = jax.random.normal(k_x, (8, input_dim), jnp.float32)
    out = jax.block_until_ready(subnet_forward(x, folded_params))
    ref = subnet_ref(x, raw_params)
    assert out.shape == (8, H2), out.shape
    assert jnp.allclose(out.astype(jnp.float32), ref, atol=2e-2, rtol=2e-2), \
        "mismatch vs reference (small batch)"

    # Ragged batch exercising the partial last grid block (no host pad / slice passes).
    x2 = jax.random.normal(k_x2, (200, input_dim), jnp.float32)
    out2 = jax.block_until_ready(subnet_forward(x2, folded_params))
    ref2 = subnet_ref(x2, raw_params)
    assert out2.shape == (200, H2), out2.shape
    assert jnp.allclose(out2.astype(jnp.float32), ref2, atol=2e-2, rtol=2e-2), \
        "mismatch vs reference (ragged batch)"

    print("KERNEL_OK")
</pallas_src>

<mosaic_0001>
module attributes {stable_mosaic.version = 11 : i64} {
  func.func @subnet_kernel(%arg0: i32, %arg1: memref<8x32xf32, #tpu.memory_space<vmem>>, %arg2: memref<32x128xf32, #tpu.memory_space<vmem>>, %arg3: memref<1x128xf32, #tpu.memory_space<vmem>>, %arg4: memref<128x64xf32, #tpu.memory_space<vmem>>, %arg5: memref<1x64xf32, #tpu.memory_space<vmem>>, %arg6: memref<8x64xbf16, #tpu.memory_space<vmem>>) attributes {dimension_semantics = [#tpu.dimension_semantics<parallel>], iteration_bounds = array<i64: 1>, scalar_prefetch = 0 : i64, scratch_operands = 0 : i64, tpu.core_type = #tpu.core_type<tc>, window_params = [{transform_indices = @transform_0, window_bounds = array<i64: 8, 32>}, {pipeline_mode = #tpu.pipeline_mode<synchronous>, transform_indices = @transform_1, window_bounds = array<i64: 32, 128>}, {pipeline_mode = #tpu.pipeline_mode<synchronous>, transform_indices = @transform_2, window_bounds = array<i64: 1, 128>}, {pipeline_mode = #tpu.pipeline_mode<synchronous>, transform_indices = @transform_3, window_bounds = array<i64: 128, 64>}, {pipeline_mode = #tpu.pipeline_mode<synchronous>, transform_indices = @transform_4, window_bounds = array<i64: 1, 64>}, {transform_indices = @transform_5, window_bounds = array<i64: 8, 64>}]} {
    %c0 = arith.constant 0 : index
    %c0_0 = arith.constant 0 : index
    %0 = vector.load %arg1[%c0, %c0_0] : memref<8x32xf32, #tpu.memory_space<vmem>>, vector<8x32xf32>
    %c0_1 = arith.constant 0 : index
    %c0_2 = arith.constant 0 : index
    %1 = vector.load %arg2[%c0_1, %c0_2] : memref<32x128xf32, #tpu.memory_space<vmem>>, vector<32x128xf32>
    %cst = arith.constant dense<0.000000e+00> : vector<8x128xf32>
    %2 = tpu.matmul %0, %1, %cst {dimension_numbers = #tpu.dot_dimension_numbers<[1], [0], [0], [1], [0, 0, 1, 1], [], []>} : vector<8x32xf32>, vector<32x128xf32>, vector<8x128xf32> -> vector<8x128xf32>
    %c0_3 = arith.constant 0 : index
    %c0_4 = arith.constant 0 : index
    %3 = vector.load %arg3[%c0_3, %c0_4] : memref<1x128xf32, #tpu.memory_space<vmem>>, vector<1x128xf32>
    %4 = vector.broadcast %3 : vector<1x128xf32> to vector<8x128xf32>
    %5 = arith.addf %2, %4 : vector<8x128xf32>
    %cst_5 = arith.constant 0.000000e+00 : f32
    %6 = vector.broadcast %cst_5 : f32 to vector<8x128xf32>
    %7 = arith.maximumf %5, %6 : vector<8x128xf32>
    %c0_6 = arith.constant 0 : index
    %c0_7 = arith.constant 0 : index
    %8 = vector.load %arg4[%c0_6, %c0_7] : memref<128x64xf32, #tpu.memory_space<vmem>>, vector<128x64xf32>
    %cst_8 = arith.constant dense<0.000000e+00> : vector<8x64xf32>
    %9 = tpu.matmul %7, %8, %cst_8 {dimension_numbers = #tpu.dot_dimension_numbers<[1], [0], [0], [1], [0, 0, 1, 1], [], []>} : vector<8x128xf32>, vector<128x64xf32>, vector<8x64xf32> -> vector<8x64xf32>
    %c0_9 = arith.constant 0 : index
    %c0_10 = arith.constant 0 : index
    %10 = vector.load %arg5[%c0_9, %c0_10] : memref<1x64xf32, #tpu.memory_space<vmem>>, vector<1x64xf32>
    %11 = vector.broadcast %10 : vector<1x64xf32> to vector<8x64xf32>
    %12 = arith.addf %9, %11 : vector<8x64xf32>
    %cst_11 = arith.constant 0.000000e+00 : f32
    %13 = vector.broadcast %cst_11 : f32 to vector<8x64xf32>
    %14 = arith.maximumf %12, %13 : vector<8x64xf32>
    %15 = arith.truncf %14 : vector<8x64xf32> to vector<8x64xbf16>
    %c0_12 = arith.constant 0 : index
    %c0_13 = arith.constant 0 : index
    %16 = vector.load %arg6[%c0_12, %c0_13] : memref<8x64xbf16, #tpu.memory_space<vmem>>, vector<8x64xbf16>
    tpu.vector_store %arg6[%c0_12, %c0_13], %15 {strides = array<i32>} : memref<8x64xbf16, #tpu.memory_space<vmem>>, vector<8x64xbf16>,
    return
  }
  func.func @transform_0(%arg0: i32) -> (i32, i32) {
    %c0_i32 = arith.constant 0 : i32
    %c0_i32_0 = arith.constant 0 : i32
    return %arg0, %c0_i32 : i32, i32
  }
  func.func @transform_1(%arg0: i32) -> (i32, i32) {
    %c0_i32 = arith.constant 0 : i32
    %c0_i32_0 = arith.constant 0 : i32
    %c0_i32_1 = arith.constant 0 : i32
    return %c0_i32, %c0_i32_0 : i32, i32
  }
  func.func @transform_2(%arg0: i32) -> (i32, i32) {
    %c0_i32 = arith.constant 0 : i32
    %c0_i32_0 = arith.constant 0 : i32
    %c0_i32_1 = arith.constant 0 : i32
    return %c0_i32, %c0_i32_0 : i32, i32
  }
  func.func @transform_3(%arg0: i32) -> (i32, i32) {
    %c0_i32 = arith.constant 0 : i32
    %c0_i32_0 = arith.constant 0 : i32
    %c0_i32_1 = arith.constant 0 : i32
    return %c0_i32, %c0_i32_0 : i32, i32
  }
  func.func @transform_4(%arg0: i32) -> (i32, i32) {
    %c0_i32 = arith.constant 0 : i32
    %c0_i32_0 = arith.constant 0 : i32
    %c0_i32_1 = arith.constant 0 : i32
    return %c0_i32, %c0_i32_0 : i32, i32
  }
  func.func @transform_5(%arg0: i32) -> (i32, i32) {
    %c0_i32 = arith.constant 0 : i32
    %c0_i32_0 = arith.constant 0 : i32
    return %arg0, %c0_i32 : i32, i32
  }
}

</mosaic_0001>

<bundles_post_ra>
// kernel: _subnet_call.1
= control target key start
LH: loop header
LB: loop body
LE: loop exit
PB: predicated region body
PF: predicated region fallthrough
CT: control target
= control target key end

     0   :  { %10 = vsyncpa [#allocation3], 0  ;;  %s649_s0 = inlined_call_operand.hbm [shape: f32[8,32], index: 0, kind: input, shape index: {}]   ;;  %s650_s1 = inlined_call_operand.hbm [shape: f32[32,128], index: 1, kind: input, shape index: {}]   ;;  %s651_s2 = inlined_call_operand.hbm [shape: f32[1,128], index: 2, kind: input, shape index: {}]   ;;  %s652_s3 = inlined_call_operand.hbm [shape: f32[128,64], index: 3, kind: input, shape index: {}]   ;;  %s653_s4 = inlined_call_operand.hbm [shape: f32[1,64], index: 4, kind: input, shape index: {}]   ;;  %s654_s5 = inlined_call_operand.hbm [shape: bf16[8,64], index: 5, kind: output, shape index: {}]  }
   0x1   :  { %11 = vsyncpa [#allocation6], 0 }
   0x2   :  { %12 = vsyncpa [#allocation9], 0 }
   0x3   :  { %13 = vsyncpa [#allocation4], 0  ;;  %s536_s18 = smov [#allocation5]   ;;  %s396_s22 = scalar_lea.hbm %s650_s1, 512 }
   0x4   :  { %s29_s19 = sshll.u32 %s536_s18, 4  ;;  %p397_p0 = scmp.ne.s32.totalorder %s650_s1, %s396_s22  ;;  %s30_s19 = int_to_ptr.vmem [resolvable:$true] %s29_s19 }
   0x5   :  { %p400_p1 = scmp.lt.u32.totalorder %s396_s22, %s650_s1 }
   0x7   :  { %p402_p2 = pnand %p400_p1, %p397_p0 }
   0x9   :  { %405 = shalt.err (!%p402_p2)
}
   0xa   :  { %s406_s27 = scalar_lea.vmem %s30_s19, 512  ;;  %p411_p4 = scmp.lt.s32.totalorder %s30_s19, %s30_s19 }
   0xb   :  { %p407_p3 = scmp.ne.s32.totalorder %s30_s19, %s406_s27  ;;  %p412_p5 = scmp.lt.s32.totalorder %s406_s27, %s406_s27 }
   0xd   :  { %p413_p6 = por %p412_p5, %p411_p4 }
   0xf   :  { %p414_p7 = pnand %p413_p6, %p407_p3 }
  0x11   :  { %417 = shalt.err (!%p414_p7)
}
  0x12   :  { %s537_s28 = smov 128   ;;  %s538_s29 = smov 8  }
  0x13   :  { %35 = dma.hbm_to_vmem [thread:$0]  %s650_s1, 512, %s30_s19, [#allocation6], %s537_s28, %s537_s28, %s538_s29  }
  0x14   :  { %s539_s7 = smov [#allocation8]   ;;  %s540_s9 = smov [#allocation2]  }
  0x15   :  { %s51_s8 = sshll.u32 %s539_s7, 4  ;;  %s20_s10 = sshll.u32 %s540_s9, 4  ;;  %s52_s8 = int_to_ptr.vmem [resolvable:$true] %s51_s8  ;;  %s21_s10 = int_to_ptr.vmem [resolvable:$true] %s20_s10 }
  0x16   :  { %s418_s13 = scalar_lea.hbm %s652_s3, 2048 }
  0x17   :  { %p419_p8 = scmp.ne.s32.totalorder %s652_s3, %s418_s13  ;;  %p422_p9 = scmp.lt.u32.totalorder %s418_s13, %s652_s3 }
  0x19   :  { %p424_p10 = pnand %p422_p9, %p419_p8 }
  0x1b   :  { %427 = shalt.err (!%p424_p10)
}
  0x1c   :  { %s428_s1 = scalar_lea.vmem %s52_s8, 2048  ;;  %p433_p12 = scmp.lt.s32.totalorder %s52_s8, %s52_s8 }
  0x1d   :  { %p429_p11 = scmp.ne.s32.totalorder %s52_s8, %s428_s1  ;;  %p434_p13 = scmp.lt.s32.totalorder %s428_s1, %s428_s1 }
  0x1f   :  { %p435_p0 = por %p434_p13, %p433_p12 }
  0x21   :  { %p436_p1 = pnand %p435_p0, %p429_p11 }
  0x23   :  { %439 = shalt.err (!%p436_p1)
}
  0x24   :  { %57 = dma.hbm_to_vmem [thread:$0]  %s652_s3, 2048, %s52_s8, [#allocation9], %s537_s28, %s537_s28, %s538_s29  }
  0x25   :  { %s440_s22 = scalar_lea.hbm %s649_s0, 128 }
  0x26   :  { %p441_p2 = scmp.ne.s32.totalorder %s649_s0, %s440_s22  ;;  %p444_p3 = scmp.lt.u32.totalorder %s440_s22, %s649_s0 }
  0x28   :  { %p446_p4 = pnand %p444_p3, %p441_p2 }
  0x2a   :  { %449 = shalt.err (!%p446_p4)
}
  0x2b   :  { %s450_s27 = scalar_lea.vmem %s21_s10, 128  ;;  %p455_p6 = scmp.lt.s32.totalorder %s21_s10, %s21_s10 }
  0x2c   :  { %p451_p5 = scmp.ne.s32.totalorder %s21_s10, %s450_s27  ;;  %p456_p7 = scmp.lt.s32.totalorder %s450_s27, %s450_s27 }
  0x2e   :  { %p457_p8 = por %p456_p7, %p455_p6 }
  0x30   :  { %p458_p9 = pnand %p457_p8, %p451_p5 }
  0x32   :  { %461 = shalt.err (!%p458_p9)
}
  0x33   :  { %23 = dma.hbm_to_vmem [thread:$0]  %s649_s0, 128, %s21_s10, [#allocation3]  }
  0x34   :  { %s541_s29 = smov [#allocation7]   ;;  %s542_s6 = smov [#allocation10]  }
  0x35   :  { %s42_s30 = sshll.u32 %s541_s29, 4  ;;  %s64_s7 = sshll.u32 %s542_s6, 4  ;;  %s43_s30 = int_to_ptr.vmem [resolvable:$true] %s42_s30  ;;  %s65_s7 = int_to_ptr.vmem [resolvable:$true] %s64_s7 }
  0x36   :  { %s462_s11 = scalar_lea.hbm %s651_s2, 16 }
  0x37   :  { %p463_p10 = scmp.ne.s32.totalorder %s651_s2, %s462_s11  ;;  %p466_p11 = scmp.lt.u32.totalorder %s462_s11, %s651_s2 }
  0x39   :  { %p468_p12 = pnand %p466_p11, %p463_p10 }
  0x3b   :  { %471 = shalt.err (!%p468_p12)
}
  0x3c   :  { %s472_s0 = scalar_lea.vmem %s43_s30, 16  ;;  %s476_s10 = scalar_lea.vmem %s43_s30, 32 }
  0x3d   :  { %p473_p13 = scmp.ne.s32.totalorder %s43_s30, %s472_s0  ;;  %p477_p0 = scmp.lt.s32.totalorder %s43_s30, %s43_s30 }
  0x3e   :  { %p478_p1 = scmp.lt.s32.totalorder %s476_s10, %s472_s0 }
  0x40   :  { %p479_p2 = por %p478_p1, %p477_p0 }
  0x42   :  { %p480_p3 = pnand %p479_p2, %p473_p13 }
  0x44   :  { %483 = shalt.err (!%p480_p3)
}
  0x45   :  { %45 = dma.hbm_to_vmem [thread:$0]  %s651_s2, 16, %s43_s30, [#allocation6]  }
  0x46   :  { %s484_s19 = scalar_lea.hbm %s653_s4, 16 }
  0x47   :  { %p485_p4 = scmp.ne.s32.totalorder %s653_s4, %s484_s19  ;;  %p488_p5 = scmp.lt.u32.totalorder %s484_s19, %s653_s4 }
  0x49   :  { %p490_p6 = pnand %p488_p5, %p485_p4 }
  0x4b   :  { %493 = shalt.err (!%p490_p6)
}
  0x4c   :  { %s494_s24 = scalar_lea.vmem %s65_s7, 16  ;;  %s498_s25 = scalar_lea.vmem %s65_s7, 32 }
  0x4d   :  { %p495_p7 = scmp.ne.s32.totalorder %s65_s7, %s494_s24  ;;  %p499_p8 = scmp.lt.s32.totalorder %s65_s7, %s65_s7 }
  0x4e   :  { %p500_p9 = scmp.lt.s32.totalorder %s498_s25, %s494_s24 }
  0x50   :  { %p501_p10 = por %p500_p9, %p499_p8 }
  0x52   :  { %p502_p11 = pnand %p501_p10, %p495_p7 }
  0x54   :  { %505 = shalt.err (!%p502_p11)
}
  0x55   :  { %67 = dma.hbm_to_vmem [thread:$0]  %s653_s4, 16, %s65_s7, [#allocation9]  }
  0x56   :  { %528 = dma.done.wait [#allocation3], 128  }
  0x57   :  { %529 = vsyncadd [#allocation3], 4294967168 }
  0x58   :  { %530 = dma.done.wait [#allocation6], 528  }
  0x59   :  { %531 = vsyncadd [#allocation6], 4294966768 }
  0x5a   :  { %532 = dma.done.wait [#allocation9], 2064  }
  0x5b   :  { %533 = vsyncadd [#allocation9], 4294965232  ;;  %v543_v0 = vmov 0.0|0.0   ;;  %vm544_vm0 = vmmov 0   ;;  %v545_v1 = vmov 0.0   ;;  %v84_v2 = vld [vmem:[#allocation5] sm:$0xff] }
  0x5c   :  { %355 = vmatprep.subr.bf16.mxu0 %v543_v0  ;;  %317 = vmatprep.mubr.msk.f32.mxu0 %vm544_vm0, %v545_v1  ;;  %v85_v3 = vld [vmem:[#allocation5 + $0x8] sm:$0xff]  ;;  %v86_v4 = vld [vmem:[#allocation5 + $0x10] sm:$0xff]  ;;  %v87_v6 = vld [vmem:[#allocation5 + $0x18] sm:$0xff]  ;;  %vm95_vm1 = vcmask 261120   ;;  %s546_s4 = smov [#allocation11]   ;;  %vm265_vm2 = vcmask 519168  }
  0x5d   :  { %361 = vmatprep.subr.bf16.mxu1 %v543_v0  ;;  %352 = vmatprep.mubr.msk.f32.mxu1 %vm544_vm0, %v545_v1  ;;  %v356_v5 = vpack.c.bf16 %v85_v3, %v84_v2  ;;  %v170_v7 = vld [vmem:[#allocation8] sm:$0xff]  ;;  %v171_v8 = vld [vmem:[#allocation8 + $0x8] sm:$0xff]  ;;  %v172_v9 = vld [vmem:[#allocation8 + $0x10] sm:$0xff]  ;;  %v359_v11 = vpack.c.bf16 %v87_v6, %v86_v4  ;;  %s273_s27 = sshll.u32 %s546_s4, 4  ;;  %s274_s27 = int_to_ptr.vmem [resolvable:$true] %s273_s27 }
  0x5e   :  { %v173_v10 = vld [vmem:[#allocation8 + $0x18] sm:$0xff]  ;;  %v362_v12 = vpack.c.bf16 %v171_v8, %v170_v7  ;;  %v174_v14 = vld [vmem:[#allocation8 + $0x20] sm:$0xff]  ;;  %v175_v15 = vld [vmem:[#allocation8 + $0x28] sm:$0xff]  ;;  %s506_s3 = scalar_lea.vmem %s274_s27, 64  ;;  %p511_p13 = scmp.lt.s32.totalorder %s274_s27, %s274_s27 }
  0x5f   :  { %357 = vmatpush3.bf16.msra.mxu0 %v356_v5  ;;  %v365_v13 = vpack.c.bf16 %v173_v10, %v172_v9  ;;  %v83_v16 = vld [vmem:[#allocation2] sm:$0xff]  ;;  %v368_v17 = vpack.c.bf16 %v175_v15, %v174_v14  ;;  %v178_v21 = vld [vmem:[#allocation8 + $0x40] sm:$0xff]  ;;  %v179_v22 = vld [vmem:[#allocation8 + $0x48] sm:$0xff]  ;;  %p507_p12 = scmp.ne.s32.totalorder %s274_s27, %s506_s3  ;;  %p512_p0 = scmp.lt.s32.totalorder %s506_s3, %s506_s3 }
  0x60   :  { %358 = vmatprep.subr.bf16.mxu0 %v543_v0  ;;  %363 = vmatpush3.bf16.msra.mxu1 %v362_v12  ;;  %v176_v18 = vld [vmem:[#allocation8 + $0x30] sm:$0xff]  ;;  %v177_v19 = vld [vmem:[#allocation8 + $0x38] sm:$0xff]  ;;  %v374_v23 = vpack.c.bf16 %v179_v22, %v178_v21  ;;  %v182_v27 = vld [vmem:[#allocation8 + $0x60] sm:$0xff] }
  0x61   :  { %364 = vmatprep.subr.bf16.mxu1 %v543_v0  ;;  %v371_v20 = vpack.c.bf16 %v177_v19, %v176_v18  ;;  %v180_v24 = vld [vmem:[#allocation8 + $0x50] sm:$0xff]  ;;  %v181_v25 = vld [vmem:[#allocation8 + $0x58] sm:$0xff]  ;;  %v183_v28 = vld [vmem:[#allocation8 + $0x68] sm:$0xff]  ;;  %p513_p1 = por %p512_p0, %p511_p13 }
  0x62   :  { %v377_v26 = vpack.c.bf16 %v181_v25, %v180_v24  ;;  %v380_v29 = vpack.c.bf16 %v183_v28, %v182_v27  ;;  %v184_v30 = vld [vmem:[#allocation8 + $0x70] sm:$0xff]  ;;  %v185_v31 = vld [vmem:[#allocation8 + $0x78] sm:$0xff]  ;;  %v286_v38 = vld [vmem:[#allocation10] ss:$0 sm:$0xff] }
  0x63   :  { %360 = vmatpush3.bf16.msra.mxu0 %v359_v11  ;;  %v383_v32 = vpack.c.bf16 %v185_v31, %v184_v30  ;;  %v284_v33 = vld [vmem:[#allocation7] ss:$0 sm:$0xff]  ;;  %p514_p2 = pnand %p513_p1, %p507_p12 }
  0x64   :  { %366 = vmatpush3.bf16.msra.mxu1 %v365_v13 }
  0x65   :  { %367 = vmatprep.subr.bf16.mxu1 %v543_v0 }
  0x66   :  { %318 = vmatmul.mubr.msk.f32.vlgmr.msra.gmra.mrb[0].mxu0 %vm95_vm1, %v83_v16 }
  0x68   :  { %369 = vmatpush3.bf16.msra.mxu1 %v368_v17 }
  0x69   :  { %370 = vmatprep.subr.bf16.mxu1 %v543_v0 }
  0x6c   :  { %372 = vmatpush3.bf16.msra.mxu1 %v371_v20 }
  0x6d   :  { %373 = vmatprep.subr.bf16.mxu1 %v543_v0 }
  0x70   :  { %375 = vmatpush3.bf16.msra.mxu1 %v374_v23 }
  0x71   :  { %376 = vmatprep.subr.bf16.mxu1 %v543_v0 }
  0x74   :  { %378 = vmatpush3.bf16.msra.mxu1 %v377_v26 }
  0x75   :  { %379 = vmatprep.subr.bf16.mxu1 %v543_v0 }
  0x78   :  { %381 = vmatpush3.bf16.msra.mxu1 %v380_v29 }
  0x79   :  { %382 = vmatprep.subr.bf16.mxu1 %v543_v0 }
  0x7c   :  { %384 = vmatpush3.bf16.msra.mxu1 %v383_v32 }
 0x139   :  { %v165_v34 = vpop.f32.mrb[0].mxu0 }
 0x13a   :  { %v166_v35 = vadd.f32 %v284_v33, %v165_v34  ;;  %v319_v36 = vpop.f32.mrb[1].mxu0 }
 0x13c   :  { %v169_v37 = vmax.f32 %v166_v35, 0.0 }
 0x13e   :  { %353 = vmatmul.mubr.f32.vlgmr.msra.gmra.mrb[0].mxu1 %v169_v37 }
 0x211   :  { %v259_v39 = vpop.f32.mrb[0].mxu1 }
 0x212   :  { %v260_v40 = vadd.f32 %v286_v38, %v259_v39  ;;  %v354_v41 = vpop.f32.mrb[1].mxu1 }
 0x214   :  { %v263_v42 = vmax.f32 %v260_v40, 0.0 }
 0x216   :  { %v264_v43 = vpack.c.bf16 %v263_v42, %v263_v42 }
 0x218   :  { %266 = vst.msk [vmem:[#allocation11] sm:$0xf] %vm265_vm2, %v264_v43 }
 0x219   :  { %517 = shalt.err (!%p514_p2)
}
 0x21a   :  { %s518_s30 = scalar_lea.hbm %s654_s5, 64 }
 0x21b   :  { %p519_p3 = scmp.ne.s32.totalorder %s654_s5, %s518_s30  ;;  %p522_p4 = scmp.lt.u32.totalorder %s518_s30, %s654_s5 }
 0x21d   :  { %p524_p5 = pnand %p522_p4, %p519_p3 }
 0x21f   :  { %527 = shalt.err (!%p524_p5)
}
 0x220   :  { %276 = dma.vmem_to_hbm [thread:$0]  %s274_s27, 64, %s654_s5, [#allocation4]  }
 0x221   :  { %534 = dma.done.wait [#allocation4], 64  }
 0x222   :  { %535 = vsyncadd [#allocation4], 4294967232 }
 0x223   :  { %280 = vsyncpa [#allocation3], 1 }
 0x224   :  { %281 = vsyncpa [#allocation6], 1 }
 0x225   :  { %282 = vsyncpa [#allocation9], 1 }
 0x226   :  { %283 = vsyncpa [#allocation4], 1 }

</bundles_post_ra>
